<compile_context>
chip_gen: v5e
topology: v5e:2x2
jax: 0.10.0
libtpu: 0.0.40
codegen_flags: <defaults>
</compile_context>

<pallas_src>
import jax
import jax.numpy as jnp
from jax.experimental import pallas as pl
from jax.experimental.pallas import tpu as pltpu


def _se_kernel(x_ref, w1_ref, b1_ref, bn_scale_ref, bn_shift_ref,
               w2_ref, b2_ref, o_ref):
    bblk, C, T = x_ref.shape

    # ---- squeeze: mean over the time (lane) axis ---------------------------
    if C % 8 == 0:
        # MXU reduction: (bblk*C, T) @ (T, 1) ones with f32 accumulation.
        # Keeps the lane-axis reduce off the XLU (the MXU is otherwise idle);
        # the leading-dim merge is layout-free when C is a sublane multiple.
        ones_col = jnp.ones((T, 1), dtype=x_ref.dtype)
        row_sum = jnp.dot(x_ref[...].reshape(bblk * C, T), ones_col,
                          preferred_element_type=jnp.float32)   # (bblk*C, 1)
        mean = row_sum.reshape(bblk, C) * (1.0 / T)              # (bblk, C)
    else:
        # Fallback: XLU lane reduce with f32 accumulation.
        mean = jnp.sum(x_ref[...].astype(jnp.float32), axis=-1) * (1.0 / T)

    # ---- excitation MLP (tiny matmuls, off the DMA critical path) ----------
    h = jnp.dot(mean, w1_ref[...],
                preferred_element_type=jnp.float32) + b1_ref[...]   # (bblk, BTL)
    h = jnp.maximum(h, 0.0)                                         # ReLU
    h = h * bn_scale_ref[...] + bn_shift_ref[...]                   # BN (eval)
    s = jax.nn.sigmoid(
        jnp.dot(h, w2_ref[...], preferred_element_type=jnp.float32)
        + b2_ref[...])                                              # (bblk, C)

    # ---- gate: re-read x so no block-sized f32 temp is pinned from line 1.
    # s[:, :, None] relayouts only the small (bblk, C) gate; the splat over T
    # is a plain lane broadcast.
    o_ref[...] = (x_ref[...].astype(jnp.float32) * s[:, :, None]).astype(o_ref.dtype)


def _vmem_capacity_bytes():
    try:
        return int(pltpu.get_tpu_info().vmem_capacity_bytes)
    except Exception:
        return 64 << 20   # conservative fallback: v7x per-TensorCore VMEM


def se_module_forward(x_nct, params, *, donate_input=False):
    """x_nct: (B, C, T), matching the PyTorch module's input layout (NCT)."""
    B, C, T = x_nct.shape
    w1, b1, bn_scale, bn_shift, w2, b2 = params
    btl = w1.shape[1]
    in_bytes = jnp.dtype(x_nct.dtype).itemsize

    # Weights/bias/BN terms are kept in f32 regardless of the input dtype.
    weight_bytes = 4 * int(w1.size + b1.size + bn_scale.size
                           + bn_shift.size + w2.size + b2.size)

    # Generation-aware VMEM policy: ~capacity/12 per block (~10.6 MiB on the
    # 128 MiB v5e/v6e, ~5.3 MiB on the 64 MiB v7x), headroom left for Mosaic.
    capacity = _vmem_capacity_bytes()
    usable = capacity - (8 << 20)
    target_block_bytes = max(1 << 20, capacity // 12)

    def _required(nb):
        blk_elems = nb * C * T
        # double-buffered input + double-buffered output + one f32 temp for
        # the gated product + resident weights + slack.
        return 4 * blk_elems * in_bytes + 4 * blk_elems + weight_bytes + (2 << 20)

    if _required(1) > usable:
        raise ValueError(
            "SEModule pallas kernel: a single (C=%d, T=%d) slab needs %d bytes "
            "of VMEM which exceeds the usable %d bytes on this chip; a T-tiled "
            "two-pass variant is required." % (C, T, _required(1), usable))

    per_b_bytes = C * T * in_bytes
    bblk = max(1, min(B, target_block_bytes // per_b_bytes))
    while bblk > 1 and _required(bblk) > usable:
        bblk -= 1
    grid = (pl.cdiv(B, bblk),)   # ragged tail block is fine (padded by Pallas)

    vmem_limit = int(min(usable, max(_required(bblk), 32 << 20)))

    cost = pl.CostEstimate(
        flops=4 * B * C * btl + 3 * B * C * T,
        transcendentals=B * C,
        bytes_accessed=2 * B * C * T * in_bytes + weight_bytes)

    # NOTE: weight/bias specs are grid-invariant; pipeline_mode=pl.Buffered(1)
    # would reclaim one extra weight copy but is skipped (tiny win, API risk).
    return pl.pallas_call(
        _se_kernel,
        out_shape=jax.ShapeDtypeStruct((B, C, T), x_nct.dtype),
        grid_spec=pltpu.PrefetchScalarGridSpec(
            num_scalar_prefetch=0,
            grid=grid,
            in_specs=[
                pl.BlockSpec((bblk, C, T), lambda b: (b, 0, 0)),   # x (NCT)
                pl.BlockSpec((C, btl), lambda b: (0, 0)),          # W1
                pl.BlockSpec((1, btl), lambda b: (0, 0)),          # b1
                pl.BlockSpec((1, btl), lambda b: (0, 0)),          # bn scale
                pl.BlockSpec((1, btl), lambda b: (0, 0)),          # bn shift
                pl.BlockSpec((btl, C), lambda b: (0, 0)),          # W2
                pl.BlockSpec((1, C), lambda b: (0, 0)),            # b2
            ],
            out_specs=pl.BlockSpec((bblk, C, T), lambda b: (b, 0, 0)),
        ),
        compiler_params=pltpu.CompilerParams(
            dimension_semantics=("parallel",),
            vmem_limit_bytes=vmem_limit),
        cost_estimate=cost,
        input_output_aliases={0: 0} if donate_input else {},
    )(x_nct, w1, b1, bn_scale, bn_shift, w2, b2)


def init_params(key, channels, bottleneck):
    """Deterministic synthetic init matching the PyTorch parameter shapes.

    conv1.weight: (bottleneck, channels, 1), conv1.bias: (bottleneck,)
    bn: gamma=1, beta=0, running_mean=0, running_var=1, eps=1e-5
    conv2.weight: (channels, bottleneck, 1), conv2.bias: (channels,)
    """
    k1, k2, k3, k4 = jax.random.split(key, 4)
    bound1 = 1.0 / (channels ** 0.5)
    bound2 = 1.0 / (bottleneck ** 0.5)

    conv1_w = jax.random.uniform(k1, (bottleneck, channels), jnp.float32,
                                 -bound1, bound1)
    conv1_b = jax.random.uniform(k2, (bottleneck,), jnp.float32, -bound1, bound1)
    conv2_w = jax.random.uniform(k3, (channels, bottleneck), jnp.float32,
                                 -bound2, bound2)
    conv2_b = jax.random.uniform(k4, (channels,), jnp.float32, -bound2, bound2)

    eps = 1e-5
    gamma = jnp.ones((bottleneck,), jnp.float32)
    beta = jnp.zeros((bottleneck,), jnp.float32)
    running_mean = jnp.zeros((bottleneck,), jnp.float32)
    running_var = jnp.ones((bottleneck,), jnp.float32)
    bn_scale = gamma / jnp.sqrt(running_var + eps)
    bn_shift = beta - running_mean * bn_scale

    # Kernel-layout weights: W1 = conv1.weight.squeeze(-1).T  (C, BTL)
    #                        W2 = conv2.weight.squeeze(-1).T  (BTL, C)
    return (conv1_w.T,
            conv1_b.reshape(1, bottleneck),
            bn_scale.reshape(1, bottleneck),
            bn_shift.reshape(1, bottleneck),
            conv2_w.T,
            conv2_b.reshape(1, channels))


def se_module_reference(x_nct, params):
    """Pure-JAX reference of the same forward (for correctness check)."""
    w1, b1, bn_scale, bn_shift, w2, b2 = params
    mean = jnp.mean(x_nct, axis=2)                     # (B, C)
    h = mean @ w1 + b1                                 # (B, BTL)
    h = jnp.maximum(h, 0.0)
    h = h * bn_scale + bn_shift
    s = jax.nn.sigmoid(h @ w2 + b2)                    # (B, C)
    return x_nct * s[:, :, None]


if __name__ == "__main__":
    B, C, T = 4, 64, 128
    BOTTLENECK = 16

    key = jax.random.PRNGKey(0)
    kx, kp = jax.random.split(key)
    x = jax.random.normal(kx, (B, C, T), jnp.float32)
    params = init_params(kp, C, BOTTLENECK)

    out = se_module_forward(x, params)
    out = jax.block_until_ready(out)

    ref = se_module_reference(x, params)
    assert out.shape == (B, C, T)
    assert jnp.allclose(out, ref, atol=1e-5, rtol=1e-5)

    print("KERNEL_OK")
</pallas_src>

<mosaic_0001>
module attributes {stable_mosaic.version = 11 : i64} {
  func.func @_se_kernel(%arg0: i32, %arg1: memref<4x64x128xf32, #tpu.memory_space<vmem>>, %arg2: memref<64x16xf32, #tpu.memory_space<vmem>>, %arg3: memref<1x16xf32, #tpu.memory_space<vmem>>, %arg4: memref<1x16xf32, #tpu.memory_space<vmem>>, %arg5: memref<1x16xf32, #tpu.memory_space<vmem>>, %arg6: memref<16x64xf32, #tpu.memory_space<vmem>>, %arg7: memref<1x64xf32, #tpu.memory_space<vmem>>, %arg8: memref<4x64x128xf32, #tpu.memory_space<vmem>>) attributes {dimension_semantics = [#tpu.dimension_semantics<parallel>], iteration_bounds = array<i64: 1>, scalar_prefetch = 0 : i64, scratch_operands = 0 : i64, tpu.core_type = #tpu.core_type<tc>, window_params = [{transform_indices = @transform_0, window_bounds = array<i64: 4, 64, 128>}, {pipeline_mode = #tpu.pipeline_mode<synchronous>, transform_indices = @transform_1, window_bounds = array<i64: 64, 16>}, {pipeline_mode = #tpu.pipeline_mode<synchronous>, transform_indices = @transform_2, window_bounds = array<i64: 1, 16>}, {pipeline_mode = #tpu.pipeline_mode<synchronous>, transform_indices = @transform_3, window_bounds = array<i64: 1, 16>}, {pipeline_mode = #tpu.pipeline_mode<synchronous>, transform_indices = @transform_4, window_bounds = array<i64: 1, 16>}, {pipeline_mode = #tpu.pipeline_mode<synchronous>, transform_indices = @transform_5, window_bounds = array<i64: 16, 64>}, {pipeline_mode = #tpu.pipeline_mode<synchronous>, transform_indices = @transform_6, window_bounds = array<i64: 1, 64>}, {transform_indices = @transform_7, window_bounds = array<i64: 4, 64, 128>}]} {
    %cst = arith.constant 1.000000e+00 : f32
    %0 = vector.broadcast %cst : f32 to vector<128x1xf32>
    %c0 = arith.constant 0 : index
    %c0_0 = arith.constant 0 : index
    %c0_1 = arith.constant 0 : index
    %1 = vector.load %arg1[%c0, %c0_0, %c0_1] : memref<4x64x128xf32, #tpu.memory_space<vmem>>, vector<4x64x128xf32>
    %2 = vector.shape_cast %1 : vector<4x64x128xf32> to vector<256x128xf32>
    %cst_2 = arith.constant dense<0.000000e+00> : vector<256x1xf32>
    %3 = tpu.matmul %2, %0, %cst_2 {dimension_numbers = #tpu.dot_dimension_numbers<[1], [0], [0], [1], [0, 0, 1, 1], [], []>} : vector<256x128xf32>, vector<128x1xf32>, vector<256x1xf32> -> vector<256x1xf32>
    %4 = vector.shape_cast %3 : vector<256x1xf32> to vector<4x64xf32>
    %cst_3 = arith.constant 7.812500e-03 : f32
    %5 = vector.broadcast %cst_3 : f32 to vector<4x64xf32>
    %6 = arith.mulf %4, %5 : vector<4x64xf32>
    %c0_4 = arith.constant 0 : index
    %c0_5 = arith.constant 0 : index
    %7 = vector.load %arg2[%c0_4, %c0_5] : memref<64x16xf32, #tpu.memory_space<vmem>>, vector<64x16xf32>
    %cst_6 = arith.constant dense<0.000000e+00> : vector<4x16xf32>
    %8 = tpu.matmul %6, %7, %cst_6 {dimension_numbers = #tpu.dot_dimension_numbers<[1], [0], [0], [1], [0, 0, 1, 1], [], []>} : vector<4x64xf32>, vector<64x16xf32>, vector<4x16xf32> -> vector<4x16xf32>
    %c0_7 = arith.constant 0 : index
    %c0_8 = arith.constant 0 : index
    %9 = vector.load %arg3[%c0_7, %c0_8] : memref<1x16xf32, #tpu.memory_space<vmem>>, vector<1x16xf32>
    %10 = vector.broadcast %9 : vector<1x16xf32> to vector<4x16xf32>
    %11 = arith.addf %8, %10 : vector<4x16xf32>
    %cst_9 = arith.constant 0.000000e+00 : f32
    %12 = vector.broadcast %cst_9 : f32 to vector<4x16xf32>
    %13 = arith.maximumf %11, %12 : vector<4x16xf32>
    %c0_10 = arith.constant 0 : index
    %c0_11 = arith.constant 0 : index
    %14 = vector.load %arg4[%c0_10, %c0_11] : memref<1x16xf32, #tpu.memory_space<vmem>>, vector<1x16xf32>
    %15 = vector.broadcast %14 : vector<1x16xf32> to vector<4x16xf32>
    %16 = arith.mulf %13, %15 : vector<4x16xf32>
    %c0_12 = arith.constant 0 : index
    %c0_13 = arith.constant 0 : index
    %17 = vector.load %arg5[%c0_12, %c0_13] : memref<1x16xf32, #tpu.memory_space<vmem>>, vector<1x16xf32>
    %18 = vector.broadcast %17 : vector<1x16xf32> to vector<4x16xf32>
    %19 = arith.addf %16, %18 : vector<4x16xf32>
    %c0_14 = arith.constant 0 : index
    %c0_15 = arith.constant 0 : index
    %20 = vector.load %arg6[%c0_14, %c0_15] : memref<16x64xf32, #tpu.memory_space<vmem>>, vector<16x64xf32>
    %cst_16 = arith.constant dense<0.000000e+00> : vector<4x64xf32>
    %21 = tpu.matmul %19, %20, %cst_16 {dimension_numbers = #tpu.dot_dimension_numbers<[1], [0], [0], [1], [0, 0, 1, 1], [], []>} : vector<4x16xf32>, vector<16x64xf32>, vector<4x64xf32> -> vector<4x64xf32>
    %c0_17 = arith.constant 0 : index
    %c0_18 = arith.constant 0 : index
    %22 = vector.load %arg7[%c0_17, %c0_18] : memref<1x64xf32, #tpu.memory_space<vmem>>, vector<1x64xf32>
    %23 = vector.broadcast %22 : vector<1x64xf32> to vector<4x64xf32>
    %24 = arith.addf %21, %23 : vector<4x64xf32>
    %25 = arith.negf %24 : vector<4x64xf32>
    %26 = math.exp %25 : vector<4x64xf32>
    %cst_19 = arith.constant 1.000000e+00 : f32
    %27 = vector.broadcast %cst_19 : f32 to vector<4x64xf32>
    %28 = arith.addf %27, %26 : vector<4x64xf32>
    %29 = arith.divf %27, %28 : vector<4x64xf32>
    %c0_20 = arith.constant 0 : index
    %c0_21 = arith.constant 0 : index
    %c0_22 = arith.constant 0 : index
    %30 = vector.load %arg1[%c0_20, %c0_21, %c0_22] : memref<4x64x128xf32, #tpu.memory_space<vmem>>, vector<4x64x128xf32>
    %31 = vector.shape_cast %29 : vector<4x64xf32> to vector<4x64x1xf32>
    %32 = vector.broadcast %31 : vector<4x64x1xf32> to vector<4x64x128xf32>
    %33 = arith.mulf %30, %32 : vector<4x64x128xf32>
    %c0_23 = arith.constant 0 : index
    %c0_24 = arith.constant 0 : index
    %c0_25 = arith.constant 0 : index
    %34 = vector.load %arg8[%c0_23, %c0_24, %c0_25] : memref<4x64x128xf32, #tpu.memory_space<vmem>>, vector<4x64x128xf32>
    tpu.vector_store %arg8[%c0_23, %c0_24, %c0_25], %33 {strides = array<i32>} : memref<4x64x128xf32, #tpu.memory_space<vmem>>, vector<4x64x128xf32>,
    return
  }
  func.func @transform_0(%arg0: i32) -> (i32, i32, i32) {
    %c0_i32 = arith.constant 0 : i32
    %c0_i32_0 = arith.constant 0 : i32
    %c0_i32_1 = arith.constant 0 : i32
    return %arg0, %c0_i32, %c0_i32_0 : i32, i32, i32
  }
  func.func @transform_1(%arg0: i32) -> (i32, i32) {
    %c0_i32 = arith.constant 0 : i32
    %c0_i32_0 = arith.constant 0 : i32
    %c0_i32_1 = arith.constant 0 : i32
    return %c0_i32, %c0_i32_0 : i32, i32
  }
  func.func @transform_2(%arg0: i32) -> (i32, i32) {
    %c0_i32 = arith.constant 0 : i32
    %c0_i32_0 = arith.constant 0 : i32
    %c0_i32_1 = arith.constant 0 : i32
    return %c0_i32, %c0_i32_0 : i32, i32
  }
  func.func @transform_3(%arg0: i32) -> (i32, i32) {
    %c0_i32 = arith.constant 0 : i32
    %c0_i32_0 = arith.constant 0 : i32
    %c0_i32_1 = arith.constant 0 : i32
    return %c0_i32, %c0_i32_0 : i32, i32
  }
  func.func @transform_4(%arg0: i32) -> (i32, i32) {
    %c0_i32 = arith.constant 0 : i32
    %c0_i32_0 = arith.constant 0 : i32
    %c0_i32_1 = arith.constant 0 : i32
    return %c0_i32, %c0_i32_0 : i32, i32
  }
  func.func @transform_5(%arg0: i32) -> (i32, i32) {
    %c0_i32 = arith.constant 0 : i32
    %c0_i32_0 = arith.constant 0 : i32
    %c0_i32_1 = arith.constant 0 : i32
    return %c0_i32, %c0_i32_0 : i32, i32
  }
  func.func @transform_6(%arg0: i32) -> (i32, i32) {
    %c0_i32 = arith.constant 0 : i32
    %c0_i32_0 = arith.constant 0 : i32
    %c0_i32_1 = arith.constant 0 : i32
    return %c0_i32, %c0_i32_0 : i32, i32
  }
  func.func @transform_7(%arg0: i32) -> (i32, i32, i32) {
    %c0_i32 = arith.constant 0 : i32
    %c0_i32_0 = arith.constant 0 : i32
    %c0_i32_1 = arith.constant 0 : i32
    return %arg0, %c0_i32, %c0_i32_0 : i32, i32, i32
  }
}

</mosaic_0001>

<bundles_post_ra>
// kernel: tpu_custom_call.1
= control target key start
LH: loop header
LB: loop body
LE: loop exit
PB: predicated region body
PF: predicated region fallthrough
CT: control target
= control target key end

     0   :  { %12 = vsyncpa [#allocation3], 0  ;;  %s1354_s0 = inlined_call_operand.hbm [shape: f32[4,64,128], index: 0, kind: input, shape index: {}]   ;;  %s1355_s1 = inlined_call_operand.vmem [shape: f32[64,16], index: 1, kind: input, shape index: {}]   ;;  %s1356_s2 = inlined_call_operand.vmem [shape: f32[1,16], index: 2, kind: input, shape index: {}]   ;;  %s1357_s3 = inlined_call_operand.vmem [shape: f32[1,16], index: 3, kind: input, shape index: {}]   ;;  %s1358_s4 = inlined_call_operand.vmem [shape: f32[1,16], index: 4, kind: input, shape index: {}]   ;;  %s1359_s5 = inlined_call_operand.vmem [shape: f32[16,64], index: 5, kind: input, shape index: {}]   ;;  %s1360_s6 = inlined_call_operand.vmem [shape: f32[1,64], index: 6, kind: input, shape index: {}]   ;;  %s1361_s7 = inlined_call_operand.hbm [shape: f32[4,64,128], index: 7, kind: output, shape index: {}]  }
   0x1   :  { %13 = vsyncpa [#allocation4], 0  ;;  %s18_s26 = sshll.u32 %s1354_s0, 4  ;;  %s956_s27 = smov [#allocation2]   ;;  %s19_s26 = int_to_ptr.hbm [resolvable:$true] %s18_s26 }
   0x2   :  { %s20_s28 = sshll.u32 %s956_s27, 4  ;;  %s957_s29 = smov 128   ;;  %s21_s28 = int_to_ptr.vmem [resolvable:$true] %s20_s28 }
   0x3   :  { %s958_s30 = smov 8  }
   0x4   :  { %26 = dma.hbm_to_vmem [thread:$0]  %s19_s26, 4096, %s21_s28, [#allocation3], %s957_s29, %s957_s29, %s958_s30  }
   0x5   :  { %952 = dma.done.wait [#allocation3], 4096  }
   0x6   :  { %953 = vsyncadd [#allocation3], 4294963200  ;;  %v959_v0 = vmov 1.0   ;;  %v1066_v1 = vld [vmem:[#allocation2] sm:$0xff]  ;;  %v1084_v5 = vld [vmem:[#allocation2 + $0x8] sm:$0xff]  ;;  %v960_v33 = vmov 0  }
   0x7   :  { %75 = vmatpush.msra.mxu0 %v959_v0  ;;  %807 = vmatpush.msra.mxu1 %v959_v0  ;;  %v1068_v2 = vld [vmem:[#allocation2 + $0x40] sm:$0xff]  ;;  %v1086_v6 = vld [vmem:[#allocation2 + $0x48] sm:$0xff]  ;;  %v1096_v9 = vld [vmem:[#allocation2 + $0x10] sm:$0xff]  ;;  %vm365_vm0 = vcmask 130112   ;;  %vm369_vm1 = vcmask 195712   ;;  %vm373_vm2 = vcmask 261312  }
   0x8   :  { %808 = vmatpush.msra.mxu2 %v959_v0  ;;  %809 = vmatpush.msra.mxu3 %v959_v0  ;;  %v1074_v3 = vld [vmem:[#allocation2 + $0x80] sm:$0xff]  ;;  %v1088_v7 = vld [vmem:[#allocation2 + $0x88] sm:$0xff]  ;;  %v1098_v10 = vld [vmem:[#allocation2 + $0x50] sm:$0xff]  ;;  %vm377_vm3 = vcmask 326912   ;;  %vm381_vm4 = vcmask 392512   ;;  %vm385_vm5 = vcmask 458112  }
   0x9   :  { %76 = vmatpush.msra.mxu0 %v959_v0  ;;  %810 = vmatpush.msra.mxu1 %v959_v0  ;;  %v1076_v4 = vld [vmem:[#allocation2 + $0xc0] sm:$0xff]  ;;  %v1090_v8 = vld [vmem:[#allocation2 + $0xc8] sm:$0xff]  ;;  %v1100_v11 = vld [vmem:[#allocation2 + $0x90] sm:$0xff]  ;;  %vm389_vm6 = vcmask 523712   ;;  %vm436_vm7 = vcmask 1041409   ;;  %vm438_vm8 = vcmask 1042434  }
   0xa   :  { %811 = vmatpush.msra.mxu2 %v959_v0  ;;  %812 = vmatpush.msra.mxu3 %v959_v0  ;;  %v1102_v12 = vld [vmem:[#allocation2 + $0xd0] sm:$0xff]  ;;  %v1108_v13 = vld [vmem:[#allocation2 + $0x18] sm:$0xff]  ;;  %v1120_v17 = vld [vmem:[#allocation2 + $0x20] sm:$0xff]  ;;  %vm440_vm9 = vcmask 1043459   ;;  %vm442_vm10 = vcmask 523264   ;;  %vm482_vm11 = vcmask 130048  }
   0xb   :  { %77 = vmatpush.msra.mxu0 %v959_v0  ;;  %813 = vmatpush.msra.mxu1 %v959_v0  ;;  %v1110_v14 = vld [vmem:[#allocation2 + $0x58] sm:$0xff]  ;;  %v1122_v18 = vld [vmem:[#allocation2 + $0x60] sm:$0xff]  ;;  %v1132_v21 = vld [vmem:[#allocation2 + $0x28] sm:$0xff]  ;;  %s791_s11 = sshll.u32 %s1361_s7, 4  ;;  %s792_s11 = int_to_ptr.hbm [resolvable:$true] %s791_s11 }
   0xc   :  { %814 = vmatpush.msra.mxu2 %v959_v0  ;;  %815 = vmatpush.msra.mxu3 %v959_v0  ;;  %v1112_v15 = vld [vmem:[#allocation2 + $0x98] sm:$0xff]  ;;  %v1124_v19 = vld [vmem:[#allocation2 + $0xa0] sm:$0xff]  ;;  %v1134_v22 = vld [vmem:[#allocation2 + $0x68] sm:$0xff] }
   0xd   :  { %78 = vmatpush.msra.mxu0 %v959_v0  ;;  %816 = vmatpush.msra.mxu1 %v959_v0  ;;  %v1114_v16 = vld [vmem:[#allocation2 + $0xd8] sm:$0xff]  ;;  %v1126_v20 = vld [vmem:[#allocation2 + $0xe0] sm:$0xff]  ;;  %v1136_v23 = vld [vmem:[#allocation2 + $0xe8] sm:$0xff] }
   0xe   :  { %817 = vmatpush.msra.mxu2 %v959_v0  ;;  %818 = vmatpush.msra.mxu3 %v959_v0  ;;  %v1138_v24 = vld [vmem:[#allocation2 + $0xa8] sm:$0xff]  ;;  %v1144_v25 = vld [vmem:[#allocation2 + $0x30] sm:$0xff]  ;;  %v1156_v29 = vld [vmem:[#allocation2 + $0x38] sm:$0xff] }
   0xf   :  { %79 = vmatpush.msra.mxu0 %v959_v0  ;;  %819 = vmatpush.msra.mxu1 %v959_v0  ;;  %v1146_v26 = vld [vmem:[#allocation2 + $0x70] sm:$0xff]  ;;  %v1158_v30 = vld [vmem:[#allocation2 + $0x78] sm:$0xff] }
  0x10   :  { %820 = vmatpush.msra.mxu2 %v959_v0  ;;  %821 = vmatpush.msra.mxu3 %v959_v0  ;;  %v1148_v27 = vld [vmem:[#allocation2 + $0xb0] sm:$0xff]  ;;  %v1160_v31 = vld [vmem:[#allocation2 + $0xb8] sm:$0xff] }
  0x11   :  { %80 = vmatpush.msra.mxu0 %v959_v0  ;;  %822 = vmatpush.msra.mxu1 %v959_v0  ;;  %v1150_v28 = vld [vmem:[#allocation2 + $0xf0] sm:$0xff]  ;;  %v1162_v32 = vld [vmem:[#allocation2 + $0xf8] sm:$0xff] }
  0x12   :  { %823 = vmatpush.msra.mxu2 %v959_v0  ;;  %824 = vmatpush.msra.mxu3 %v959_v0 }
  0x13   :  { %81 = vmatpush.msra.mxu0 %v959_v0  ;;  %825 = vmatpush.msra.mxu1 %v959_v0 }
  0x14   :  { %826 = vmatpush.msra.mxu2 %v959_v0  ;;  %827 = vmatpush.msra.mxu3 %v959_v0 }
  0x15   :  { %82 = vmatpush.msra.mxu0 %v959_v0  ;;  %828 = vmatpush.msra.mxu1 %v959_v0 }
  0x16   :  { %829 = vmatpush.msra.mxu2 %v959_v0  ;;  %830 = vmatpush.msra.mxu3 %v959_v0 }
  0x17   :  { %83 = vmatpush.msra.mxu0 %v959_v0  ;;  %831 = vmatpush.msra.mxu1 %v959_v0 }
  0x18   :  { %832 = vmatpush.msra.mxu2 %v959_v0  ;;  %833 = vmatpush.msra.mxu3 %v959_v0 }
  0x19   :  { %84 = vmatpush.msra.mxu0 %v959_v0  ;;  %834 = vmatpush.msra.mxu1 %v959_v0 }
  0x1a   :  { %835 = vmatpush.msra.mxu2 %v959_v0  ;;  %836 = vmatpush.msra.mxu3 %v959_v0 }
  0x1b   :  { %85 = vmatpush.msra.mxu0 %v959_v0  ;;  %837 = vmatpush.msra.mxu1 %v959_v0 }
  0x1c   :  { %838 = vmatpush.msra.mxu2 %v959_v0  ;;  %839 = vmatpush.msra.mxu3 %v959_v0 }
  0x1d   :  { %86 = vmatpush.msra.mxu0 %v959_v0  ;;  %840 = vmatpush.msra.mxu1 %v959_v0 }
  0x1e   :  { %841 = vmatpush.msra.mxu2 %v959_v0  ;;  %842 = vmatpush.msra.mxu3 %v959_v0 }
  0x1f   :  { %87 = vmatpush.msra.mxu0 %v959_v0  ;;  %843 = vmatpush.msra.mxu1 %v959_v0 }
  0x20   :  { %844 = vmatpush.msra.mxu2 %v959_v0  ;;  %845 = vmatpush.msra.mxu3 %v959_v0 }
  0x21   :  { %88 = vmatpush.msra.mxu0 %v959_v0  ;;  %846 = vmatpush.msra.mxu1 %v959_v0 }
  0x22   :  { %847 = vmatpush.msra.mxu2 %v959_v0  ;;  %848 = vmatpush.msra.mxu3 %v959_v0 }
  0x23   :  { %89 = vmatpush.msra.mxu0 %v959_v0  ;;  %849 = vmatpush.msra.mxu1 %v959_v0 }
  0x24   :  { %850 = vmatpush.msra.mxu2 %v959_v0  ;;  %851 = vmatpush.msra.mxu3 %v959_v0 }
  0x25   :  { %90 = vmatpush.msra.mxu0 %v959_v0  ;;  %852 = vmatpush.msra.mxu1 %v959_v0 }
  0x26   :  { %91 = vmatmul.f32.vlgmr.msra.gmra.mxu0 %v1066_v1  ;;  %115 = vmatmul.f32.vlgmr.msra.gmra.mxu1 %v1068_v2 }
  0x27   :  { %853 = vmatpush.msra.mxu2 %v959_v0  ;;  %854 = vmatpush.msra.mxu3 %v959_v0 }
  0x28   :  { %139 = vmatmul.f32.vlgmr.msra.gmra.mxu2 %v1074_v3  ;;  %163 = vmatmul.f32.vlgmr.msra.gmra.mxu3 %v1076_v4 }
  0x29   :  { %862 = vset.pattern.permute.xlu1 %v960_v33  ;;  %861 = vset.pattern.permute.xlu0 %v960_v33 }
  0x2a   :  { %863 = vset.pattern.permute.xlu2 %v960_v33 }
  0x2e   :  { %94 = vmatmul.f32.gmra.mxu0 %v1084_v5  ;;  %118 = vmatmul.f32.gmra.mxu1 %v1086_v6 }
  0x30   :  { %142 = vmatmul.f32.gmra.mxu2 %v1088_v7  ;;  %166 = vmatmul.f32.gmra.mxu3 %v1090_v8 }
  0x36   :  { %97 = vmatmul.f32.gmra.mxu0 %v1096_v9  ;;  %121 = vmatmul.f32.gmra.mxu1 %v1098_v10 }
  0x38   :  { %145 = vmatmul.f32.gmra.mxu2 %v1100_v11  ;;  %169 = vmatmul.f32.gmra.mxu3 %v1102_v12 }
  0x3e   :  { %100 = vmatmul.f32.gmra.mxu0 %v1108_v13  ;;  %124 = vmatmul.f32.gmra.mxu1 %v1110_v14 }
  0x40   :  { %148 = vmatmul.f32.gmra.mxu2 %v1112_v15  ;;  %172 = vmatmul.f32.gmra.mxu3 %v1114_v16 }
  0x46   :  { %103 = vmatmul.f32.gmra.mxu0 %v1120_v17  ;;  %127 = vmatmul.f32.gmra.mxu1 %v1122_v18 }
  0x48   :  { %151 = vmatmul.f32.gmra.mxu2 %v1124_v19  ;;  %175 = vmatmul.f32.gmra.mxu3 %v1126_v20 }
  0x4e   :  { %106 = vmatmul.f32.gmra.mxu0 %v1132_v21  ;;  %130 = vmatmul.f32.gmra.mxu1 %v1134_v22 }
  0x50   :  { %178 = vmatmul.f32.gmra.mxu3 %v1136_v23  ;;  %154 = vmatmul.f32.gmra.mxu2 %v1138_v24 }
  0x56   :  { %109 = vmatmul.f32.gmra.mxu0 %v1144_v25  ;;  %133 = vmatmul.f32.gmra.mxu1 %v1146_v26 }
  0x58   :  { %157 = vmatmul.f32.gmra.mxu2 %v1148_v27  ;;  %181 = vmatmul.f32.gmra.mxu3 %v1150_v28 }
  0x5e   :  { %112 = vmatmul.f32.gmra.mxu0 %v1156_v29  ;;  %136 = vmatmul.f32.gmra.mxu1 %v1158_v30 }
  0x60   :  { %160 = vmatmul.f32.gmra.mxu2 %v1160_v31  ;;  %184 = vmatmul.f32.gmra.mxu3 %v1162_v32 }
  0xa3   :  { %v92_v34 = vpop.f32.mrf.mxu0  ;;  %v116_v35 = vpop.f32.mrf.mxu1 }
  0xa4   :  { %v188_v36 = vmul.f32 0.0078125, %v92_v34  ;;  %v196_v37 = vmul.f32 0.0078125, %v116_v35 }
  0xa6   :  { %289 = vperm.xlu1 %862, %v196_v37   ;;  %265 = vperm.xlu0 %861, %v188_v36  }
  0xab   :  { %v95_v38 = vpop.f32.mrf.mxu0  ;;  %v119_v39 = vpop.f32.mrf.mxu1 }
  0xac   :  { %v197_v40 = vmul.f32 0.0078125, %v119_v39  ;;  %v140_v41 = vpop.f32.mrf.mxu2  ;;  %v164_v42 = vpop.f32.mrf.mxu3  ;;  %v189_v45 = vmul.f32 0.0078125, %v95_v38 }
  0xad   :  { %v204_v43 = vmul.f32 0.0078125, %v140_v41  ;;  %v212_v44 = vmul.f32 0.0078125, %v164_v42 }
  0xae   :  { %292 = vperm.xlu1 %862, %v197_v40  }
  0xaf   :  { %337 = vperm.xlu2 %863, %v212_v44   ;;  %313 = vperm.xlu0 %861, %v204_v43  }
  0xb3   :  { %v98_v46 = vpop.f32.mrf.mxu0  ;;  %v122_v51 = vpop.f32.mrf.mxu1 }
  0xb4   :  { %v190_v47 = vmul.f32 0.0078125, %v98_v46  ;;  %v143_v48 = vpop.f32.mrf.mxu2  ;;  %v167_v49 = vpop.f32.mrf.mxu3  ;;  %v198_v53 = vmul.f32 0.0078125, %v122_v51 }
  0xb5   :  { %v205_v50 = vmul.f32 0.0078125, %v143_v48  ;;  %v213_v52 = vmul.f32 0.0078125, %v167_v49 }
  0xb7   :  { %316 = vperm.xlu1 %862, %v205_v50   ;;  %268 = vperm.xlu0 %861, %v189_v45  }
  0xb8   :  { %271 = vperm.xlu2 %863, %v190_v47  }
  0xbb   :  { %v101_v57 = vpop.f32.mrf.mxu0  ;;  %v125_v58 = vpop.f32.mrf.mxu1 }
  0xbc   :  { %v146_v54 = vpop.f32.mrf.mxu2  ;;  %v170_v55 = vpop.f32.mrf.mxu3  ;;  %v199_v59 = vmul.f32 0.0078125, %v125_v58  ;;  %v191_v61 = vmul.f32 0.0078125, %v101_v57 }
  0xbd   :  { %v206_v56 = vmul.f32 0.0078125, %v146_v54  ;;  %v214_v60 = vmul.f32 0.0078125, %v170_v55 }
  0xbf   :  { %319 = vperm.xlu1 %862, %v206_v56   ;;  %340 = vperm.xlu0 %861, %v213_v52  }
  0xc0   :  { %295 = vperm.xlu2 %863, %v198_v53  }
  0xc3   :  { %v104_v0 = vpop.f32.mrf.mxu0  ;;  %v128_v35 = vpop.f32.mrf.mxu1 }
  0xc4   :  { %v173_v62 = vpop.f32.mrf.mxu3  ;;  %v149_v63 = vpop.f32.mrf.mxu2  ;;  %v192_v33 = vmul.f32 0.0078125, %v104_v0  ;;  %v200_v41 = vmul.f32 0.0078125, %v128_v35 }
  0xc5   :  { %v207_v34 = vmul.f32 0.0078125, %v149_v63  ;;  %v215_v36 = vmul.f32 0.0078125, %v173_v62 }
  0xc7   :  { %343 = vperm.xlu1 %862, %v214_v60   ;;  %298 = vperm.xlu0 %861, %v199_v59  }
  0xc8   :  { %274 = vperm.xlu2 %863, %v191_v61  }
  0xcb   :  { %v107_v42 = vpop.f32.mrf.mxu0  ;;  %v131_v43 = vpop.f32.mrf.mxu1 }
  0xcc   :  { %v176_v37 = vpop.f32.mrf.mxu3  ;;  %v152_v38 = vpop.f32.mrf.mxu2  ;;  %v201_v45 = vmul.f32 0.0078125, %v131_v43  ;;  %v193_v47 = vmul.f32 0.0078125, %v107_v42 }
  0xcd   :  { %v208_v39 = vmul.f32 0.0078125, %v152_v38  ;;  %v216_v40 = vmul.f32 0.0078125, %v176_v37 }
  0xcf   :  { %322 = vperm.xlu0 %861, %v207_v34   ;;  %277 = vperm.xlu1 %862, %v192_v33   ;;  %v360_v34 = vlaneseq }
  0xd0   :  { %346 = vperm.xlu2 %863, %v215_v36  }
  0xd1   :  { %v1168_v35 = vshrl.u32 %v360_v34, 7  ;;  %v1171_v36 = vand.u32 127, %v360_v34 }
  0xd3   :  { %v110_v49 = vpop.f32.mrf.mxu0  ;;  %v134_v50 = vpop.f32.mrf.mxu1 }
  0xd4   :  { %v179_v44 = vpop.f32.mrf.mxu3  ;;  %v155_v48 = vpop.f32.mrf.mxu2  ;;  %v194_v51 = vmul.f32 0.0078125, %v110_v49  ;;  %v202_v52 = vmul.f32 0.0078125, %v134_v50  ;;  %v367_v49 = vadd.s32 4294967280, %v1171_v36 }
  0xd5   :  { %v217_v46 = vmul.f32 0.0078125, %v179_v44  ;;  %v209_v53 = vmul.f32 0.0078125, %v155_v48  ;;  %v363_v48 = vadd.s32 4294967288, %v1171_v36 }
  0xd7   :  { %349 = vperm.xlu0 %861, %v216_v40   ;;  %325 = vperm.xlu1 %862, %v208_v39   ;;  %v227_v39 = vld [vmem:[%s1355_s1 + $0x38] sm:$0xff] }
  0xd8   :  { %301 = vperm.xlu2 %863, %v200_v41   ;;  %453 = vmatpush.msrb.mxu1 %v227_v39  ;;  %v226_v41 = vld [vmem:[%s1355_s1 + $0x30] sm:$0xff] }
  0xda   :  { %454 = vmatpush.msrb.mxu1 %v226_v41  ;;  %v223_v41 = vld [vmem:[%s1355_s1 + $0x18] sm:$0xff] }
  0xdb   :  { %v113_v56 = vpop.f32.mrf.mxu0  ;;  %v137_v57 = vpop.f32.mrf.mxu1 }
  0xdc   :  { %v182_v54 = vpop.f32.mrf.mxu3  ;;  %v158_v55 = vpop.f32.mrf.mxu2  ;;  %v195_v58 = vmul.f32 0.0078125, %v113_v56  ;;  %v203_v60 = vmul.f32 0.0078125, %v137_v57 }
  0xdd   :  { %v210_v59 = vmul.f32 0.0078125, %v158_v55  ;;  %v218_v33 = vmul.f32 0.0078125, %v182_v54 }
  0xdf   :  { %304 = vperm.xlu0 %861, %v201_v45   ;;  %352 = vperm.xlu1 %862, %v217_v46  }
  0xe0   :  { %280 = vperm.xlu2 %863, %v193_v47   ;;  %v225_v47 = vld [vmem:[%s1355_s1 + $0x28] sm:$0xff] }
  0xe1   :  { %455 = vmatpush.msrb.mxu1 %v225_v47 }
  0xe4   :  { %v185_v61 = vpop.f32.mrf.mxu3  ;;  %v161_v62 = vpop.f32.mrf.mxu2 }
  0xe5   :  { %v219_v63 = vmul.f32 0.0078125, %v185_v61  ;;  %v211_v0 = vmul.f32 0.0078125, %v161_v62 }
  0xe7   :  { %307 = vperm.xlu1 %862, %v202_v52   ;;  %283 = vperm.xlu0 %861, %v194_v51  }
  0xe8   :  { %328 = vperm.xlu2 %863, %v209_v53  }
  0xef   :  { %331 = vperm.xlu0 %861, %v210_v59   ;;  %286 = vperm.xlu1 %862, %v195_v58   ;;  %v224_v58 = vld [vmem:[%s1355_s1 + $0x20] sm:$0xff]  ;;  %v371_v59 = vadd.s32 4294967272, %v1171_v36 }
  0xf0   :  { %310 = vperm.xlu2 %863, %v203_v60   ;;  %456 = vmatpush.msrb.mxu1 %v224_v58 }
  0xf2   :  { %457 = vmatpush.msrb.mxu1 %v223_v41 }
  0xf7   :  { %355 = vperm.xlu0 %861, %v218_v33   ;;  %358 = vperm.xlu1 %862, %v219_v63  }
  0xf8   :  { %334 = vperm.xlu2 %863, %v211_v0  }
 0x100   :  { %864 = vset.pattern.permute.xlu2 %v1168_v35 }
 0x109   :  { %v338_v37 = vpop.permute.xlu2 %337 }
 0x10a   :  { %v421_v38 = vperm.slane %v338_v37, %v1171_v36 }
 0x112   :  { %v272_v40 = vpop.permute.xlu2 %271 }
 0x113   :  { %v368_v33 = vperm.slane %v272_v40, %v367_v49 }
 0x118   :  { %v290_v42 = vpop.permute.xlu1 %289  ;;  %v266_v43 = vpop.permute.xlu0 %265 }
 0x119   :  { %v391_v44 = vperm.slane %v290_v42, %v1171_v36  ;;  %v362_v45 = vperm.slane %v266_v43, %v1171_v36 }
 0x11a   :  { %v296_v46 = vpop.permute.xlu2 %295 }
 0x11b   :  { %v394_v53 = vperm.slane %v296_v46, %v367_v49 }
 0x120   :  { %v293_v50 = vpop.permute.xlu1 %292 }
 0x121   :  { %v392_v51 = vperm.slane %v293_v50, %v363_v48  ;;  %v314_v52 = vpop.permute.xlu0 %313 }
 0x122   :  { %v406_v54 = vperm.slane %v314_v52, %v1171_v36  ;;  %v275_v55 = vpop.permute.xlu2 %274 }
 0x123   :  { %v393_v56 = vsel %vm365_vm0, %v392_v51, %v391_v44  ;;  %v372_v34 = vperm.slane %v275_v55, %v371_v59 }
 0x124   :  { %v395_v57 = vsel %vm369_vm1, %v394_v53, %v393_v56  ;;  %v375_v53 = vadd.s32 4294967264, %v1171_v36 }
 0x129   :  { %v317_v60 = vpop.permute.xlu1 %316  ;;  %v269_v61 = vpop.permute.xlu0 %268 }
 0x12a   :  { %v407_v62 = vperm.slane %v317_v60, %v363_v48  ;;  %v364_v63 = vperm.slane %v269_v61, %v363_v48  ;;  %v347_v0 = vpop.permute.xlu2 %346 }
 0x12b   :  { %v426_v60 = vperm.slane %v347_v0, %v371_v59 }
 0x12c   :  { %v408_v37 = vsel %vm365_vm0, %v407_v62, %v406_v54  ;;  %v366_v39 = vsel %vm365_vm0, %v364_v63, %v362_v45  ;;  %v222_v45 = vld [vmem:[%s1355_s1 + $0x10] sm:$0xff] }
 0x12d   :  { %v370_v42 = vsel %vm369_vm1, %v368_v33, %v366_v39  ;;  %458 = vmatpush.msrb.mxu1 %v222_v45  ;;  %v221_v33 = vld [vmem:[%s1355_s1 + $0x8] sm:$0xff] }
 0x12e   :  { %v374_v43 = vsel %vm373_vm2, %v372_v34, %v370_v42 }
 0x12f   :  { %459 = vmatpush.msrb.mxu1 %v221_v33 }
 0x131   :  { %v320_v44 = vpop.permute.xlu1 %319  ;;  %v341_v46 = vpop.permute.xlu0 %340 }
 0x132   :  { %v409_v47 = vperm.slane %v320_v44, %v367_v49  ;;  %v422_v50 = vperm.slane %v341_v46, %v363_v48  ;;  %v302_v52 = vpop.permute.xlu2 %301 }
 0x133   :  { %v398_v61 = vperm.slane %v302_v52, %v375_v53 }
 0x134   :  { %v410_v40 = vsel %vm369_vm1, %v409_v47, %v408_v37  ;;  %v423_v51 = vsel %vm365_vm0, %v422_v50, %v421_v38  ;;  %v220_v47 = vld [vmem:[%s1355_s1] sm:$0xff] }
 0x135   :  { %460 = vmatpush.msrb.mxu1 %v220_v47 }
 0x139   :  { %v344_v54 = vpop.permute.xlu1 %343  ;;  %v299_v55 = vpop.permute.xlu0 %298 }
 0x13a   :  { %v424_v56 = vperm.slane %v344_v54, %v367_v49  ;;  %v396_v58 = vperm.slane %v299_v55, %v371_v59  ;;  %v281_v34 = vpop.permute.xlu2 %280  ;;  %v379_v49 = vadd.s32 4294967256, %v1171_v36 }
 0x13c   :  { %v425_v48 = vsel %vm369_vm1, %v424_v56, %v423_v51  ;;  %v397_v62 = vsel %vm373_vm2, %v396_v58, %v395_v57  ;;  %v380_v42 = vperm.slane %v281_v34, %v379_v49  ;;  %v476_v58 = vld [vmem:[%s1359_s5] sm:$0xff]  ;;  %v383_v34 = vadd.s32 4294967248, %v1171_v36 }
 0x13d   :  { %v427_v38 = vsel %vm373_vm2, %v426_v60, %v425_v48  ;;  %v399_v63 = vsel %vm377_vm3, %v398_v61, %v397_v62 }
 0x141   :  { %v323_v37 = vpop.permute.xlu0 %322  ;;  %v278_v39 = vpop.permute.xlu1 %277 }
 0x142   :  { %v411_v0 = vperm.slane %v323_v37, %v371_v59  ;;  %v376_v41 = vperm.slane %v278_v39, %v375_v53  ;;  %v329_v50 = vpop.permute.xlu2 %328  ;;  %v387_v37 = vadd.s32 4294967240, %v1171_v36 }
 0x143   :  { %v415_v59 = vperm.slane %v329_v50, %v379_v49 }
 0x144   :  { %v412_v57 = vsel %vm373_vm2, %v411_v0, %v410_v40  ;;  %v378_v44 = vsel %vm377_vm3, %v376_v41, %v374_v43  ;;  %v477_v43 = vld [vmem:[%s1359_s5 + $0x8] sm:$0xff] }
 0x145   :  { %v382_v46 = vsel %vm381_vm4, %v380_v42, %v378_v44  ;;  %500 = vmatpush.msrb.mxu2 %v477_v43 }
 0x147   :  { %501 = vmatpush.msrb.mxu2 %v476_v58 }
 0x149   :  { %v350_v51 = vpop.permute.xlu0 %349  ;;  %v326_v52 = vpop.permute.xlu1 %325 }
 0x14a   :  { %v428_v45 = vperm.slane %v350_v51, %v375_v53  ;;  %v413_v54 = vperm.slane %v326_v52, %v375_v53  ;;  %v311_v33 = vpop.permute.xlu2 %310 }
 0x14c   :  { %v429_v55 = vsel %vm377_vm3, %v428_v45, %v427_v38  ;;  %v414_v56 = vsel %vm377_vm3, %v413_v54, %v412_v57  ;;  %v404_v57 = vperm.slane %v311_v33, %v387_v37 }
 0x14d   :  { %v416_v40 = vsel %vm381_vm4, %v415_v59, %v414_v56 }
 0x151   :  { %v305_v60 = vpop.permute.xlu0 %304  ;;  %v353_v61 = vpop.permute.xlu1 %352 }
 0x152   :  { %v400_v48 = vperm.slane %v305_v60, %v379_v49  ;;  %v430_v53 = vperm.slane %v353_v61, %v379_v49  ;;  %v335_v47 = vpop.permute.xlu2 %334 }
 0x153   :  { %v419_v36 = vperm.slane %v335_v47, %v387_v37 }
 0x154   :  { %v401_v62 = vsel %vm381_vm4, %v400_v48, %v399_v63  ;;  %v431_v38 = vsel %vm381_vm4, %v430_v53, %v429_v55 }
 0x159   :  { %v308_v39 = vpop.permute.xlu1 %307  ;;  %v284_v0 = vpop.permute.xlu0 %283 }
 0x15a   :  { %v402_v41 = vperm.slane %v308_v39, %v383_v34  ;;  %v384_v42 = vperm.slane %v284_v0, %v383_v34  ;;  %v897_v0 = vld [vmem:[%s1357_s3] ss:$0 sm:$0xff] }
 0x15c   :  { %v403_v44 = vsel %vm385_vm5, %v402_v41, %v401_v62  ;;  %v386_v49 = vsel %vm385_vm5, %v384_v42, %v382_v46  ;;  %v1252_v42 = vadd.s32 8, %v1168_v35 }
 0x15d   :  { %v405_v63 = vsel %vm389_vm6, %v404_v57, %v403_v44  ;;  %v1255_v57 = vadd.s32 16, %v1168_v35  ;;  %v899_v44 = vld [vmem:[%s1360_s6] ss:$0 sm:$0xff] }
 0x15e   :  { %865 = vset.pattern.permute.xlu0 %v1252_v42 }
 0x15f   :  { %866 = vset.pattern.permute.xlu1 %v1255_v57 }
 0x161   :  { %v332_v50 = vpop.permute.xlu0 %331  ;;  %v287_v51 = vpop.permute.xlu1 %286 }
 0x162   :  { %v417_v52 = vperm.slane %v332_v50, %v383_v34  ;;  %v388_v45 = vperm.slane %v287_v51, %v387_v37 }
 0x164   :  { %v418_v54 = vsel %vm385_vm5, %v417_v52, %v416_v40  ;;  %v390_v59 = vsel %vm389_vm6, %v388_v45, %v386_v49  ;;  %v896_v40 = vld [vmem:[%s1356_s2] ss:$0 sm:$0xff] }
 0x165   :  { %v420_v55 = vsel %vm389_vm6, %v419_v36, %v418_v54  ;;  %v437_v56 = vsel %vm436_vm7, %v405_v63, %v390_v59 }
 0x166   :  { %v439_v43 = vsel %vm438_vm8, %v420_v55, %v437_v56 }
 0x169   :  { %v356_v58 = vpop.permute.xlu0 %355  ;;  %v359_v46 = vpop.permute.xlu1 %358 }
 0x16a   :  { %v432_v60 = vperm.slane %v356_v58, %v383_v34  ;;  %v434_v61 = vperm.slane %v359_v46, %v387_v37 }
 0x16c   :  { %v433_v48 = vsel %vm385_vm5, %v432_v60, %v431_v38  ;;  %v898_v38 = vld [vmem:[%s1358_s4] ss:$0 sm:$0xff]  ;;  %s961_s4 = smov [#allocation5]  }
 0x16d   :  { %v435_v53 = vsel %vm389_vm6, %v434_v61, %v433_v48  ;;  %v1263_v61 = vadd.s32 32, %v1168_v35  ;;  %v1266_v48 = vadd.s32 48, %v1168_v35  ;;  %s789_s6 = sshll.u32 %s961_s4, 4  ;;  %s790_s6 = int_to_ptr.vmem [resolvable:$true] %s789_s6 }
 0x16e   :  { %v441_v62 = vsel %vm440_vm9, %v435_v53, %v439_v43  ;;  %v1269_v53 = vadd.s32 24, %v1168_v35 }
 0x16f   :  { %804 = vmatmul.msk.f32.vlgmr.msrb.gmra.mxu1 %vm442_vm10, %v441_v62  ;;  %v1275_v62 = vadd.s32 56, %v1168_v35 }
 0x1ec   :  { %v462_v33 = vpop.f32.mrf.mxu1 }
 0x1ed   :  { %v463_v39 = vadd.f32 %v896_v40, %v462_v33  ;;  %v1278_v40 = vadd.s32 40, %v1168_v35 }
 0x1ef   :  { %v465_v34 = vmax.f32 %v463_v39, 0.0 }
 0x1f1   :  { %v470_v37 = vmul.f32 %v897_v0, %v465_v34 }
 0x1f3   :  { %v475_v41 = vadd.f32 %v898_v38, %v470_v37 }
 0x1f5   :  { %805 = vmatmul.msk.f32.vlgmr.msrb.gmra.mxu2 %vm482_vm11, %v475_v41 }
 0x278   :  { %v503_v49 = vpop.f32.mrf.mxu2 }
 0x279   :  { %v504_v63 = vadd.f32 %v899_v44, %v503_v49 }
 0x27b   :  { %v806_v47 = vmul.f32 -1.442695, %v504_v63 }
 0x27d   :  { %900 = vpow2.f32 %v806_v47 }
 0x283   :  { %v901_v50 = vpop.eup %900 }
 0x284   :  { %v509_v51 = vadd.f32 1.0, %v901_v50 }
 0x286   :  { %902 = vrcp.f32 %v509_v51  ;;  %v521_v54 = vand.u32 2147483648, %v509_v51  ;;  %v519_v55 = vand.u32 2147483647, %v509_v51  ;;  %vm515_vm13 = vweird.f32 %v509_v51 }
 0x288   :  { %v522_v43 = vor.u32 1.1754944e-38, %v521_v54  ;;  %vm520_vm15 = vcmp.eq.f32.partialorder %v519_v55, 8.507059e+37 }
 0x28c   :  { %v903_v52 = vpop.eup %902 }
 0x28d   :  { %v511_v45 = vmul.f32 %v903_v52, %v509_v51  ;;  %vm516_vm12 = vweird.f32 %v903_v52 }
 0x28e   :  { %vm517_vm14 = vmor %vm515_vm13, %vm516_vm12 }
 0x28f   :  { %v512_v36 = vsub.f32 1.0, %v511_v45 }
 0x291   :  { %v513_v59 = vmul.f32 %v903_v52, %v512_v36 }
 0x293   :  { %v514_v56 = vadd.f32 %v903_v52, %v513_v59 }
 0x295   :  { %v518_v58 = vsel %vm517_vm14, %v903_v52, %v514_v56 }
 0x296   :  { %v523_v46 = vsel %vm520_vm15, %v522_v43, %v518_v58 }
 0x297   :  { %v525_v60 = vperm.slane %v523_v46, 0  ;;  %v574_v33 = vperm.slane %v523_v46, 1  ;;  %v623_v39 = vperm.slane %v523_v46, 2  ;;  %v1292_v0 = vperm.slane %v523_v46, 3 }
 0x299   :  { %542 = vperm.xlu1 %866, %v525_v60   ;;  %536 = vperm.xlu0 %865, %v525_v60  }
 0x29a   :  { %530 = vperm.xlu2 %864, %v525_v60  }
 0x2a1   :  { %868 = vset.pattern.permute.xlu1 %v1263_v61  ;;  %870 = vset.pattern.permute.xlu0 %v1266_v48 }
 0x2a2   :  { %867 = vset.pattern.permute.xlu2 %v1269_v53 }
 0x2a9   :  { %554 = vperm.xlu1 %868, %v525_v60   ;;  %566 = vperm.xlu0 %870, %v525_v60  }
 0x2aa   :  { %548 = vperm.xlu2 %867, %v525_v60  }
 0x2b1   :  { %871 = vset.pattern.permute.xlu1 %v1275_v62  ;;  %875 = vset.pattern.permute.xlu0 %v1269_v53 }
 0x2b2   :  { %869 = vset.pattern.permute.xlu2 %v1278_v40 }
 0x2b9   :  { %572 = vperm.xlu1 %871, %v525_v60   ;;  %597 = vperm.xlu0 %875, %v574_v33  }
 0x2ba   :  { %560 = vperm.xlu2 %869, %v525_v60  }
 0x2c1   :  { %873 = vset.pattern.permute.xlu1 %v1252_v42  ;;  %880 = vset.pattern.permute.xlu0 %v1168_v35 }
 0x2c2   :  { %872 = vset.pattern.permute.xlu2 %v1168_v35 }
 0x2c9   :  { %585 = vperm.xlu1 %873, %v574_v33   ;;  %628 = vperm.xlu0 %880, %v623_v39  }
 0x2ca   :  { %579 = vperm.xlu2 %872, %v574_v33  }
 0x2d1   :  { %876 = vset.pattern.permute.xlu1 %v1263_v61  ;;  %885 = vset.pattern.permute.xlu0 %v1278_v40 }
 0x2d2   :  { %874 = vset.pattern.permute.xlu2 %v1255_v57 }
 0x2d9   :  { %603 = vperm.xlu1 %876, %v574_v33   ;;  %658 = vperm.xlu0 %885, %v623_v39  }
 0x2da   :  { %591 = vperm.xlu2 %874, %v574_v33  }
 0x2e1   :  { %878 = vset.pattern.permute.xlu1 %v1266_v48  ;;  %890 = vset.pattern.permute.xlu0 %v1255_v57 }
 0x2e2   :  { %877 = vset.pattern.permute.xlu2 %v1278_v40 }
 0x2e9   :  { %615 = vperm.xlu1 %878, %v574_v33   ;;  %689 = vperm.xlu0 %890, %v1292_v0  }
 0x2ea   :  { %609 = vperm.xlu2 %877, %v574_v33  }
 0x2f1   :  { %881 = vset.pattern.permute.xlu1 %v1252_v42  ;;  %895 = vset.pattern.permute.xlu0 %v1275_v62 }
 0x2f2   :  { %879 = vset.pattern.permute.xlu2 %v1275_v62 }
 0x2f4   :  { %v531_v34 = vpop.permute.xlu2 %530 }
 0x2f5   :  { %v721_v38 = vmul.f32 %v531_v34, %v1066_v1 }
 0x2f7   :  { %753 = vst [vmem:[#allocation5] sm:$0xff] %v721_v38 }
 0x2f9   :  { %634 = vperm.xlu1 %881, %v623_v39   ;;  %719 = vperm.xlu0 %895, %v1292_v0  }
 0x2fa   :  { %621 = vperm.xlu2 %879, %v574_v33  }
 0x301   :  { %883 = vset.pattern.permute.xlu1 %v1269_v53 }
 0x302   :  { %882 = vset.pattern.permute.xlu2 %v1255_v57 }
 0x304   :  { %v549_v37 = vpop.permute.xlu2 %548 }
 0x305   :  { %v724_v41 = vmul.f32 %v549_v37, %v1108_v13 }
 0x307   :  { %756 = vst [vmem:[#allocation5 + $0x18] sm:$0xff] %v724_v41 }
 0x309   :  { %646 = vperm.xlu1 %883, %v623_v39  }
 0x30a   :  { %640 = vperm.xlu2 %882, %v623_v39  }
 0x30b   :  { %v543_v44 = vpop.permute.xlu1 %542  ;;  %v537_v49 = vpop.permute.xlu0 %536 }
 0x30c   :  { %v723_v63 = vmul.f32 %v543_v44, %v1096_v9  ;;  %v722_v1 = vmul.f32 %v537_v49, %v1084_v5 }
 0x30e   :  { %755 = vst [vmem:[#allocation5 + $0x10] sm:$0xff] %v723_v63 }
 0x30f   :  { %754 = vst [vmem:[#allocation5 + $0x8] sm:$0xff] %v722_v1 }
 0x311   :  { %886 = vset.pattern.permute.xlu1 %v1266_v48 }
 0x312   :  { %884 = vset.pattern.permute.xlu2 %v1263_v61 }
 0x314   :  { %v561_v47 = vpop.permute.xlu2 %560 }
 0x315   :  { %v726_v57 = vmul.f32 %v561_v47, %v1132_v21 }
 0x317   :  { %758 = vst [vmem:[#allocation5 + $0x28] sm:$0xff] %v726_v57 }
 0x319   :  { %664 = vperm.xlu1 %886, %v623_v39  }
 0x31a   :  { %652 = vperm.xlu2 %884, %v623_v39  }
 0x31b   :  { %v555_v13 = vpop.permute.xlu1 %554  ;;  %v567_v50 = vpop.permute.xlu0 %566 }
 0x31c   :  { %v725_v51 = vmul.f32 %v555_v13, %v1120_v17  ;;  %v727_v9 = vmul.f32 %v567_v50, %v1144_v25 }
 0x31e   :  { %757 = vst [vmem:[#allocation5 + $0x20] sm:$0xff] %v725_v51 }
 0x31f   :  { %759 = vst [vmem:[#allocation5 + $0x30] sm:$0xff] %v727_v9 }
 0x321   :  { %888 = vset.pattern.permute.xlu1 %v1168_v35 }
 0x322   :  { %887 = vset.pattern.permute.xlu2 %v1275_v62 }
 0x324   :  { %v580_v5 = vpop.permute.xlu2 %579 }
 0x325   :  { %v729_v52 = vmul.f32 %v580_v5, %v1068_v2 }
 0x327   :  { %761 = vst [vmem:[#allocation5 + $0x40] sm:$0xff] %v729_v52 }
 0x329   :  { %677 = vperm.xlu1 %888, %v1292_v0  }
 0x32a   :  { %670 = vperm.xlu2 %887, %v623_v39  }
 0x32b   :  { %v573_v21 = vpop.permute.xlu1 %572  ;;  %v598_v45 = vpop.permute.xlu0 %597 }
 0x32c   :  { %v728_v36 = vmul.f32 %v573_v21, %v1156_v29  ;;  %v732_v17 = vmul.f32 %v598_v45, %v1110_v14 }
 0x32e   :  { %760 = vst [vmem:[#allocation5 + $0x38] sm:$0xff] %v728_v36 }
 0x32f   :  { %764 = vst [vmem:[#allocation5 + $0x58] sm:$0xff] %v732_v17 }
 0x331   :  { %891 = vset.pattern.permute.xlu1 %v1269_v53 }
 0x332   :  { %889 = vset.pattern.permute.xlu2 %v1252_v42 }
 0x334   :  { %v592_v25 = vpop.permute.xlu2 %591 }
 0x335   :  { %v731_v35 = vmul.f32 %v592_v25, %v1098_v10 }
 0x337   :  { %763 = vst [vmem:[#allocation5 + $0x50] sm:$0xff] %v731_v35 }
 0x339   :  { %695 = vperm.xlu1 %891, %v1292_v0  }
 0x33a   :  { %683 = vperm.xlu2 %889, %v1292_v0  }
 0x33b   :  { %v586_v2 = vpop.permute.xlu1 %585  ;;  %v629_v54 = vpop.permute.xlu0 %628 }
 0x33c   :  { %v730_v29 = vmul.f32 %v586_v2, %v1086_v6  ;;  %v737_v14 = vmul.f32 %v629_v54, %v1074_v3 }
 0x33e   :  { %762 = vst [vmem:[#allocation5 + $0x48] sm:$0xff] %v730_v29 }
 0x33f   :  { %769 = vst [vmem:[#allocation5 + $0x80] sm:$0xff] %v737_v14 }
 0x341   :  { %893 = vset.pattern.permute.xlu1 %v1278_v40 }
 0x342   :  { %892 = vset.pattern.permute.xlu2 %v1263_v61 }
 0x344   :  { %v610_v42 = vpop.permute.xlu2 %609 }
 0x345   :  { %v734_v10 = vmul.f32 %v610_v42, %v1134_v22 }
 0x347   :  { %766 = vst [vmem:[#allocation5 + $0x68] sm:$0xff] %v734_v10 }
 0x349   :  { %707 = vperm.xlu1 %893, %v1292_v0  }
 0x34a   :  { %701 = vperm.xlu2 %892, %v1292_v0  }
 0x34b   :  { %v604_v59 = vpop.permute.xlu1 %603  ;;  %v659_v55 = vpop.permute.xlu0 %658 }
 0x34c   :  { %v733_v6 = vmul.f32 %v604_v59, %v1122_v18  ;;  %v742_v3 = vmul.f32 %v659_v55, %v1138_v24 }
 0x34e   :  { %765 = vst [vmem:[#allocation5 + $0x60] sm:$0xff] %v733_v6 }
 0x34f   :  { %774 = vst [vmem:[#allocation5 + $0xa8] sm:$0xff] %v742_v3 }
 0x352   :  { %894 = vset.pattern.permute.xlu2 %v1266_v48 }
 0x354   :  { %v622_v56 = vpop.permute.xlu2 %621 }
 0x355   :  { %v736_v43 = vmul.f32 %v622_v56, %v1158_v30 }
 0x357   :  { %768 = vst [vmem:[#allocation5 + $0x78] sm:$0xff] %v736_v43 }
 0x35a   :  { %713 = vperm.xlu2 %894, %v1292_v0  }
 0x35b   :  { %v616_v22 = vpop.permute.xlu1 %615  ;;  %v690_v58 = vpop.permute.xlu0 %689 }
 0x35c   :  { %v735_v46 = vmul.f32 %v616_v22, %v1146_v26  ;;  %v747_v60 = vmul.f32 %v690_v58, %v1102_v12 }
 0x35e   :  { %767 = vst [vmem:[#allocation5 + $0x70] sm:$0xff] %v735_v46 }
 0x35f   :  { %779 = vst [vmem:[#allocation5 + $0xd0] sm:$0xff] %v747_v60 }
 0x364   :  { %v641_v18 = vpop.permute.xlu2 %640 }
 0x365   :  { %v739_v24 = vmul.f32 %v641_v18, %v1100_v11 }
 0x367   :  { %771 = vst [vmem:[#allocation5 + $0x90] sm:$0xff] %v739_v24 }
 0x36b   :  { %v635_v61 = vpop.permute.xlu1 %634  ;;  %v720_v48 = vpop.permute.xlu0 %719 }
 0x36c   :  { %v738_v53 = vmul.f32 %v635_v61, %v1088_v7  ;;  %v752_v30 = vmul.f32 %v720_v48, %v1162_v32 }
 0x36e   :  { %770 = vst [vmem:[#allocation5 + $0x88] sm:$0xff] %v738_v53 }
 0x36f   :  { %784 = vst [vmem:[#allocation5 + $0xf8] sm:$0xff] %v752_v30 }
 0x374   :  { %v653_v62 = vpop.permute.xlu2 %652 }
 0x375   :  { %v741_v40 = vmul.f32 %v653_v62, %v1124_v19 }
 0x377   :  { %773 = vst [vmem:[#allocation5 + $0xa0] sm:$0xff] %v741_v40 }
 0x37b   :  { %v647_v26 = vpop.permute.xlu1 %646 }
 0x37c   :  { %v740_v12 = vmul.f32 %v647_v26, %v1112_v15 }
 0x37e   :  { %772 = vst [vmem:[#allocation5 + $0x98] sm:$0xff] %v740_v12 }
 0x384   :  { %v671_v33 = vpop.permute.xlu2 %670 }
 0x385   :  { %v744_v11 = vmul.f32 %v671_v33, %v1160_v31 }
 0x387   :  { %776 = vst [vmem:[#allocation5 + $0xb8] sm:$0xff] %v744_v11 }
 0x38b   :  { %v665_v39 = vpop.permute.xlu1 %664 }
 0x38c   :  { %v743_v0 = vmul.f32 %v665_v39, %v1148_v27 }
 0x38e   :  { %775 = vst [vmem:[#allocation5 + $0xb0] sm:$0xff] %v743_v0 }
 0x394   :  { %v684_v7 = vpop.permute.xlu2 %683 }
 0x395   :  { %v746_v32 = vmul.f32 %v684_v7, %v1090_v8 }
 0x397   :  { %778 = vst [vmem:[#allocation5 + $0xc8] sm:$0xff] %v746_v32 }
 0x39b   :  { %v678_v34 = vpop.permute.xlu1 %677 }
 0x39c   :  { %v745_v19 = vmul.f32 %v678_v34, %v1076_v4 }
 0x39e   :  { %777 = vst [vmem:[#allocation5 + $0xc0] sm:$0xff] %v745_v19 }
 0x3a4   :  { %v702_v38 = vpop.permute.xlu2 %701 }
 0x3a5   :  { %v749_v15 = vmul.f32 %v702_v38, %v1126_v20 }
 0x3a7   :  { %781 = vst [vmem:[#allocation5 + $0xe0] sm:$0xff] %v749_v15 }
 0x3ab   :  { %v696_v37 = vpop.permute.xlu1 %695 }
 0x3ac   :  { %v748_v31 = vmul.f32 %v696_v37, %v1114_v16 }
 0x3ae   :  { %780 = vst [vmem:[#allocation5 + $0xd8] sm:$0xff] %v748_v31 }
 0x3b4   :  { %v714_v41 = vpop.permute.xlu2 %713 }
 0x3b5   :  { %v751_v27 = vmul.f32 %v714_v41, %v1150_v28 }
 0x3b7   :  { %783 = vst [vmem:[#allocation5 + $0xf0] sm:$0xff] %v751_v27 }
 0x3bb   :  { %v708_v4 = vpop.permute.xlu1 %707 }
 0x3bc   :  { %v750_v8 = vmul.f32 %v708_v4, %v1136_v23 }
 0x3be   :  { %782 = vst [vmem:[#allocation5 + $0xe8] sm:$0xff] %v750_v8 }
 0x3bf   :  { %797 = dma.vmem_to_hbm [thread:$0]  %s790_s6, 4096, %s792_s11, [#allocation4], %s957_s29, %s957_s29, %s958_s30  }
 0x3c0   :  { %954 = dma.done.wait [#allocation4], 4096  }
 0x3c1   :  { %955 = vsyncadd [#allocation4], 4294963200 }
 0x3c2   :  { %802 = vsyncpa [#allocation3], 1 }
 0x3c3   :  { %803 = vsyncpa [#allocation4], 1 }

</bundles_post_ra>
